<compile_context>
chip_gen: v7x
topology: tpu7x:2x2x1
jax: 0.10.0
libtpu: 0.0.40
codegen_flags: <defaults>
</compile_context>

<pallas_src>
import jax
import jax.numpy as jnp
from jax.experimental import pallas as pl
from jax.experimental.pallas import tpu as pltpu


def _sinusoidal_kernel(t_ref, inv_ref, phase_ref, o_ref):
    # t_ref: [TB, 1] f32, inv_ref/phase_ref: [1, D] f32, o_ref: [TB, D] f32
    # arg = t * (1/div_term); odd lanes carry a +pi/2 phase so sin covers cos too.
    # [TB,1] broadcasts along lanes, [1,D] broadcasts along sublanes (both cheap).
    arg = t_ref[...] * inv_ref[...] + phase_ref[...]
    o_ref[...] = jnp.sin(arg)


def sinusoidal_embedding(time_t, embedding_dim, *, block_rows=1024):
    """Pallas TPU implementation of SinusoidalEmbedding.forward.

    time_t: [B, 1] float32
    returns: [B, embedding_dim] float32
    """
    if embedding_dim % 2 != 0:
        raise ValueError("Embedding dimensions must be divisible by 2")
    time_t = time_t.astype(jnp.float32)
    B = time_t.shape[0]
    D = embedding_dim

    # torch: div_term = 10000 ** ((2*pos // 2) / D); for integer-valued pos,
    # floor(2*pos/2) == pos, so the exponent is simply pos / D.
    position = jnp.arange(0, D, dtype=jnp.float32)
    div_term = jnp.power(jnp.float32(10000.0), position / jnp.float32(D))
    inv_div = (1.0 / div_term).reshape(1, D)                       # lane-only, hoisted
    phase = ((jnp.arange(D) % 2).astype(jnp.float32) * (jnp.pi / 2)).reshape(1, D)

    # Row tile: big enough to amortize per-step overhead (~0.35 us/step), small
    # enough that the double-buffered output block stays well under scoped VMEM.
    max_rows_by_vmem = max(8, (4 * 1024 * 1024) // (D * 4))
    tb = min(B, block_rows, max_rows_by_vmem)
    if tb < B:
        tb = max(8, (tb // 8) * 8)  # sublane alignment when tiling the batch

    return pl.pallas_call(
        _sinusoidal_kernel,
        out_shape=jax.ShapeDtypeStruct((B, D), jnp.float32),
        grid=(pl.cdiv(B, tb),),
        in_specs=[
            pl.BlockSpec((tb, 1), lambda i: (i, 0)),
            pl.BlockSpec((1, D), lambda i: (0, 0)),   # constant block -> stays resident
            pl.BlockSpec((1, D), lambda i: (0, 0)),
        ],
        out_specs=pl.BlockSpec((tb, D), lambda i: (i, 0)),
        compiler_params=pltpu.CompilerParams(
            dimension_semantics=("parallel",),  # rows independent -> shards across TCs
        ),
    )(time_t, inv_div, phase)


def _reference(time_t, embedding_dim):
    # pure-JAX mirror of the PyTorch forward (literal formula, sin/cos on even/odd cols)
    position = jnp.arange(0, embedding_dim, dtype=jnp.float32)
    div_term = jnp.power(
        jnp.float32(10000.0),
        jnp.floor_divide(2.0 * position, 2.0) / jnp.float32(embedding_dim),
    )
    emb = jnp.zeros((time_t.shape[0], embedding_dim), dtype=jnp.float32)
    emb = emb.at[:, 0::2].set(jnp.sin(time_t / div_term[0::2]))
    emb = emb.at[:, 1::2].set(jnp.cos(time_t / div_term[1::2]))
    return emb


if __name__ == "__main__":
    key = jax.random.PRNGKey(0)
    batch_size = 8
    embedding_dim = 128  # lane-dense output (multiple of 128)
    # diffusion-style timesteps: positive scalars per batch element
    time_t = jax.random.uniform(
        key, (batch_size, 1), minval=0.0, maxval=1000.0, dtype=jnp.float32
    )

    out = jax.block_until_ready(sinusoidal_embedding(time_t, embedding_dim))
    ref = _reference(time_t, embedding_dim)

    assert out.shape == (batch_size, embedding_dim)
    assert out.dtype == jnp.float32
    # Tolerance note: arguments reach |t/div_term| ~ 1e3, where a single-ulp f32
    # difference in the frequency (t*inv_div vs t/div) or in the +pi/2 phase fold
    # (sin(x+pi/2) vs cos(x)) is amplified to O(1e-4) after sin/cos; 1e-3 bounds
    # that comfortably while still catching real formula errors.
    assert jnp.allclose(out, ref, atol=1e-3, rtol=1e-5), float(
        jnp.max(jnp.abs(out - ref))
    )
    print("KERNEL_OK")
</pallas_src>

<mosaic_0001>
module attributes {stable_mosaic.version = 11 : i64} {
  func.func @_sinusoidal_kernel(%arg0: i32, %arg1: memref<8x1xf32, #tpu.memory_space<vmem>>, %arg2: memref<1x128xf32, #tpu.memory_space<vmem>>, %arg3: memref<1x128xf32, #tpu.memory_space<vmem>>, %arg4: memref<8x128xf32, #tpu.memory_space<vmem>>) attributes {dimension_semantics = [#tpu.dimension_semantics<parallel>], iteration_bounds = array<i64: 1>, scalar_prefetch = 0 : i64, scratch_operands = 0 : i64, tpu.core_type = #tpu.core_type<tc>, window_params = [{transform_indices = @transform_0, window_bounds = array<i64: 8, 1>}, {pipeline_mode = #tpu.pipeline_mode<synchronous>, transform_indices = @transform_1, window_bounds = array<i64: 1, 128>}, {pipeline_mode = #tpu.pipeline_mode<synchronous>, transform_indices = @transform_2, window_bounds = array<i64: 1, 128>}, {transform_indices = @transform_3, window_bounds = array<i64: 8, 128>}]} {
    %c0 = arith.constant 0 : index
    %c0_0 = arith.constant 0 : index
    %0 = vector.load %arg1[%c0, %c0_0] : memref<8x1xf32, #tpu.memory_space<vmem>>, vector<8x1xf32>
    %c0_1 = arith.constant 0 : index
    %c0_2 = arith.constant 0 : index
    %1 = vector.load %arg2[%c0_1, %c0_2] : memref<1x128xf32, #tpu.memory_space<vmem>>, vector<1x128xf32>
    %2 = vector.broadcast %0 : vector<8x1xf32> to vector<8x128xf32>
    %3 = vector.broadcast %1 : vector<1x128xf32> to vector<8x128xf32>
    %4 = arith.mulf %2, %3 : vector<8x128xf32>
    %c0_3 = arith.constant 0 : index
    %c0_4 = arith.constant 0 : index
    %5 = vector.load %arg3[%c0_3, %c0_4] : memref<1x128xf32, #tpu.memory_space<vmem>>, vector<1x128xf32>
    %6 = vector.broadcast %5 : vector<1x128xf32> to vector<8x128xf32>
    %7 = arith.addf %4, %6 : vector<8x128xf32>
    %8 = math.sin %7 : vector<8x128xf32>
    %c0_5 = arith.constant 0 : index
    %c0_6 = arith.constant 0 : index
    %9 = vector.load %arg4[%c0_5, %c0_6] : memref<8x128xf32, #tpu.memory_space<vmem>>, vector<8x128xf32>
    tpu.vector_store %arg4[%c0_5, %c0_6], %8 {strides = array<i32>} : memref<8x128xf32, #tpu.memory_space<vmem>>, vector<8x128xf32>,
    return
  }
  func.func @transform_0(%arg0: i32) -> (i32, i32) {
    %c0_i32 = arith.constant 0 : i32
    %c0_i32_0 = arith.constant 0 : i32
    return %arg0, %c0_i32 : i32, i32
  }
  func.func @transform_1(%arg0: i32) -> (i32, i32) {
    %c0_i32 = arith.constant 0 : i32
    %c0_i32_0 = arith.constant 0 : i32
    %c0_i32_1 = arith.constant 0 : i32
    return %c0_i32, %c0_i32_0 : i32, i32
  }
  func.func @transform_2(%arg0: i32) -> (i32, i32) {
    %c0_i32 = arith.constant 0 : i32
    %c0_i32_0 = arith.constant 0 : i32
    %c0_i32_1 = arith.constant 0 : i32
    return %c0_i32, %c0_i32_0 : i32, i32
  }
  func.func @transform_3(%arg0: i32) -> (i32, i32) {
    %c0_i32 = arith.constant 0 : i32
    %c0_i32_0 = arith.constant 0 : i32
    return %arg0, %c0_i32 : i32, i32
  }
}

</mosaic_0001>

<bundles_post_ra>
// kernel: tpu_custom_call.1
= control target key start
LH: loop header
LB: loop body
LE: loop exit
PB: predicated region body
PF: predicated region fallthrough
CT: control target
= control target key end

     0   :  { %v203_v1 = vmov 0   ;;  %s273_s0 = inlined_call_operand.vmem [shape: f32[8,1], index: 0, kind: input, shape index: {}]   ;;  %s274_s1 = inlined_call_operand.vmem [shape: f32[1,128], index: 1, kind: input, shape index: {}]   ;;  %s275_s2 = inlined_call_operand.vmem [shape: f32[1,128], index: 2, kind: input, shape index: {}]   ;;  %s276_s3 = inlined_call_operand.hbm [shape: f32[8,128], index: 3, kind: output, shape index: {}]  }
   0x1   :  { %v15_v0 = vld [vmem:[%s273_s0] sm:$0xff]  ;;  %174 = vset.pattern.permute.xlu0 %v203_v1 }
   0x2   :  { %19 = vperm.xlu0 %174, %v15_v0  }
   0x3   :  { %8 = vsyncpa [#allocation3], 0  ;;  %v156_v2 = vld [vmem:[%s274_s1] ss:$0 sm:$0xff]  ;;  %v204_v18 = vmov 2102212464  }
   0x4   :  { %v157_v3 = vld [vmem:[%s275_s2] ss:$0 sm:$0xff]  ;;  %v205_v20 = vmov 920167782   ;;  %v206_v24 = vmov 1326507024  }
   0x5   :  { %v207_v26 = vmov 683565275   ;;  %v208_v28 = vmov 2475754826   ;;  %v209_v31 = vmov 2131351028  }
   0x6   :  { %s210_s0 = smov [#allocation2]  }
   0x7   :  { %s148_s1 = sshll.u32 %s210_s0, 4  ;;  %s149_s1 = int_to_ptr.vmem [resolvable:$true] %s148_s1 }
   0x8   :  { %s179_s2 = scalar_lea.vmem %s149_s1, 128  ;;  %p184_p1 = scmp.lt.s32.totalorder %s149_s1, %s149_s1 }
   0x9   :  { %p180_p0 = scmp.ne.s32.totalorder %s149_s1, %s179_s2  ;;  %p185_p2 = scmp.lt.s32.totalorder %s179_s2, %s179_s2 }
   0xb   :  { %p186_p3 = por %p185_p2, %p184_p1 }
   0xd   :  { %p187_p4 = pnand %p186_p3, %p180_p0 }
  0x81   :  { %v20_v4 = vpop.permute.xlu0 %19 }
  0x82   :  { %v28_v5 = vmul.f32 %v156_v2, %v20_v4 }
  0x84   :  { %v240_v6 = vadd.f32 %v157_v3, %v28_v5 }
  0x86   :  { %v40_v7 = vand.u32 2139095040, %v240_v6  ;;  %v37_v8 = vand.u32 2147483647, %v240_v6  ;;  %vm39_vm7 = vcmp.lt.s32.totalorder %v240_v6, 0  ;;  %vm129_vm12 = vweird.f32 %v240_v6 }
  0x88   :  { %v41_v9 = vshrl.u32 %v40_v7, 23  ;;  %v44_v11 = vand.u32 8388607, %v37_v8  ;;  %vm38_vm8 = vcmp.le.f32.partialorder %v37_v8, 0.7853982 }
  0x8a   :  { %v158_v10 = vadd.s32 4294967169, %v41_v9  ;;  %v45_v14 = vor.u32 8388608, %v44_v11 }
  0x8c   :  { %v47_v12 = vadd.s32 1, %v158_v10  ;;  %v85_v22 = vshll.u32 %v45_v14, 8 }
  0x8e   :  { %vm48_vm0 = vcmp.gt.s32.totalorder %v47_v12, 0 }
  0x8f   :  { %v49_v13 = vsel %vm48_vm0, %v47_v12, 0 }
  0x90   :  { %v51_v15 = vand.u32 31, %v49_v13  ;;  %v50_v16 = vshrl.u32 %v49_v13, 5 }
  0x92   :  { %v52_v17 = vsub.s32 32, %v51_v15  ;;  %v63_v19 = vshll.u32 %v204_v18, %v51_v15  ;;  %v66_v21 = vshll.u32 %v205_v20, %v51_v15  ;;  %v54_v27 = vshll.u32 %v207_v26, %v51_v15 }
  0x93   :  { %v57_v30 = vshll.u32 %v208_v28, %v51_v15  ;;  %v60_v33 = vshll.u32 %v209_v31, %v51_v15  ;;  %vm72_vm1 = vcmp.lt.s32.totalorder %v50_v16, 4  ;;  %vm69_vm2 = vcmp.lt.s32.totalorder %v50_v16, 1 }
  0x94   :  { %v64_v23 = vshrl.u32 %v205_v20, %v52_v17  ;;  %v67_v25 = vshrl.u32 %v206_v24, %v52_v17  ;;  %v55_v29 = vshrl.u32 %v208_v28, %v52_v17  ;;  %v58_v32 = vshrl.u32 %v209_v31, %v52_v17 }
  0x95   :  { %v61_v34 = vshrl.u32 %v204_v18, %v52_v17  ;;  %v53_v38 = vshrl.u32 %v207_v26, %v52_v17  ;;  %vm70_vm3 = vcmp.lt.s32.totalorder %v50_v16, 2  ;;  %vm71_vm4 = vcmp.lt.s32.totalorder %v50_v16, 3 }
  0x96   :  { %v65_v35 = vor.u32 %v64_v23, %v63_v19  ;;  %v68_v36 = vor.u32 %v67_v25, %v66_v21  ;;  %v56_v37 = vor.u32 %v55_v29, %v54_v27  ;;  %v59_v39 = vor.u32 %v58_v32, %v57_v30 }
  0x97   :  { %v62_v40 = vor.u32 %v61_v34, %v60_v33 }
  0x98   :  { %v78_v41 = vsel %vm72_vm1, %v65_v35, 920167782  ;;  %v82_v42 = vsel %vm72_vm1, %v68_v36, 1326507024  ;;  %v77_v44 = vsel %vm69_vm2, %v56_v37, %v59_v39  ;;  %v73_v47 = vsel %vm69_vm2, %v53_v38, %v56_v37 }
  0x99   :  { %v74_v43 = vsel %vm72_vm1, %v62_v40, 2102212464  ;;  %v79_v45 = vsel %vm71_vm4, %v62_v40, %v78_v41  ;;  %v81_v46 = vsel %vm69_vm2, %v59_v39, %v62_v40  ;;  %v83_v50 = vsel %vm71_vm4, %v65_v35, %v82_v42 }
  0x9a   :  { %v75_v48 = vsel %vm71_vm4, %v59_v39, %v74_v43  ;;  %v80_v49 = vsel %vm70_vm3, %v77_v44, %v79_v45  ;;  %v84_v51 = vsel %vm70_vm3, %v81_v46, %v83_v50 }
  0x9b   :  { %v246_v52 = vmul.u32.u64.low %v85_v22, %v80_v49  ;;  %v247_v53 = vmul.u32.u64.high %v85_v22, %v80_v49, %v246_v52  ;;  %v249_v54 = vmul.u32.u64.low %v85_v22, %v84_v51  ;;  %v250_v55 = vmul.u32.u64.high %v85_v22, %v84_v51, %v249_v54 }
  0x9c   :  { %v76_v56 = vsel %vm70_vm3, %v73_v47, %v75_v48 }
  0x9d   :  { %v95_v57 = vadd.s32 1, %v247_v53  ;;  %v92_v58 = vmul.u32 %v85_v22, %v76_v56  ;;  %vm94_vm5 = vc.u32 %v250_v55, %v246_v52  ;;  %v93_v7 = vadd.s32 %v246_v52, %v250_v55 }
  0x9f   :  { %v96_v59 = vsel %vm94_vm5, %v95_v57, %v247_v53 }
  0xa0   :  { %v97_v60 = vadd.s32 %v96_v59, %v92_v58 }
  0xa2   :  { %v98_v61 = vadd.s32 536870912, %v97_v60 }
  0xa4   :  { %v99_v62 = vshrl.u32 %v98_v61, 30 }
  0xa6   :  { %v100_v63 = vshll.u32 %v99_v62, 30  ;;  %v123_v20 = vsub.s32 4, %v99_v62 }
  0xa8   :  { %v101_v0 = vsub.s32 %v97_v60, %v100_v63  ;;  %v124_v23 = vsel %vm39_vm7, %v123_v20, %v99_v62 }
  0xa9   :  { %v126_v25 = vsel %vm38_vm8, 0, %v124_v23 }
  0xaa   :  { %v103_v1 = vsub.s32 0, %v101_v0  ;;  %v130_v26 = vadd.s32 3, %v126_v25 }
  0xac   :  { %v159_v2 = vmin.u32 %v103_v1, %v101_v0  ;;  %v131_v27 = vand.u32 3, %v130_v26 }
  0xae   :  { %v105_v3 = vclz %v159_v2  ;;  %vm136_vm9 = vcmp.eq.s32.totalorder %v131_v27, 2  ;;  %vm133_vm10 = vcmp.eq.s32.totalorder %v131_v27, 0  ;;  %vm132_vm11 = vcmp.lt.s32.totalorder %v131_v27, 2 }
  0xb0   :  { %v160_v4 = vadd.s32 4294967294, %v105_v3 }
  0xb2   :  { %vm161_vm6 = vcmp.lt.s32.totalorder %v160_v4, 0 }
  0xb3   :  { %v108_v5 = vsel %vm161_vm6, 0, %v160_v4 }
  0xb4   :  { %v109_v9 = vsub.s32 32, %v108_v5  ;;  %v113_v10 = vsub.s32 4294967266, %v108_v5  ;;  %v110_v11 = vshll.u32 %v101_v0, %v108_v5 }
  0xb6   :  { %v111_v12 = vshrl.u32 %v93_v7, %v109_v9  ;;  %v114_v13 = vadd.s32 127, %v113_v10 }
  0xb8   :  { %v112_v14 = vor.u32 %v111_v12, %v110_v11  ;;  %v115_v15 = vshll.u32 %v114_v13, 23 }
  0xba   :  { %v116_v16 = vor.u32 4788187, %v115_v15  ;;  %v119_v18 = vcvt.s32.f32 %v112_v14 }
  0xbc   :  { %v117_v17 = vand.u32 2147483647, %v116_v16 }
  0xbe   :  { %v120_v19 = vmul.f32 %v119_v18, %v117_v17 }
  0xc0   :  { %v121_v21 = vxor.u32 2147483648, %v120_v19 }
  0xc2   :  { %v122_v22 = vsel %vm39_vm7, %v121_v21, %v120_v19 }
  0xc3   :  { %v125_v24 = vsel %vm38_vm8, %v240_v6, %v122_v22 }
  0xc4   :  { %175 = vcosq.f32 %v125_v24 }
  0xc5   :  { %177 = vsinq.f32 %v125_v24 }
  0xce   :  { %v176_v28 = vpop.eup %175 }
  0xcf   :  { %v178_v29 = vpop.eup %177  ;;  %v137_v30 = vxor.u32 2147483648, %v176_v28 }
  0xd0   :  { %v134_v31 = vxor.u32 2147483648, %v178_v29 }
  0xd1   :  { %v138_v32 = vsel %vm136_vm9, %v137_v30, %v178_v29 }
  0xd2   :  { %v135_v8 = vsel %vm133_vm10, %v176_v28, %v134_v31 }
  0xd3   :  { %v139_v33 = vsel %vm132_vm11, %v135_v8, %v138_v32 }
  0xd4   :  { %v140_v34 = vsel %vm129_vm12, nan, %v139_v33 }
  0xd5   :  { %141 = vst [vmem:[#allocation2] sm:$0xff] %v140_v34 }
  0xd6   :  { %190 = shalt.err (!%p187_p4)
}
  0xd7   :  { %s191_s20 = scalar_lea.hbm %s276_s3, 128 }
  0xd8   :  { %p192_p5 = scmp.ne.s32.totalorder %s276_s3, %s191_s20  ;;  %p195_p6 = scmp.lt.u32.totalorder %s191_s20, %s276_s3 }
  0xda   :  { %p197_p7 = pnand %p195_p6, %p192_p5 }
  0xdc   :  { %200 = shalt.err (!%p197_p7)
}
  0xdd   :  { %151 = dma.vmem_to_hbm [thread:$0]  %s149_s1, 128, %s276_s3, [#allocation3]  }
  0xde   :  { %201 = dma.done.wait [#allocation3], 128  }
  0xdf   :  { %202 = vsyncadd [#allocation3], 4294967168 }
  0xe0   :  { %155 = vsyncpa [#allocation3], 1 }

</bundles_post_ra>
